<compile_context>
chip_gen: v7x
topology: tpu7x:2x2x1
jax: 0.10.0
libtpu: 0.0.40
codegen_flags: <defaults>
</compile_context>

<pallas_src>
import functools

import jax
import jax.numpy as jnp
from jax.experimental import pallas as pl
from jax.experimental.pallas import tpu as pltpu


# ---- packed parameter slab layout (f32, shape (16, 128)) --------------------
# layer 1: W1 (8,2)   rows 0:8,  cols  0:2  ; b1 (8,)  rows 0:8,  col  2
# layer 2: W2 (16,8)  rows 0:16, cols  8:16 ; b2 (16,) rows 0:16, col 16
# layer 3: W3 (8,16)  rows 0:8,  cols 32:48 ; b3 (8,)  rows 0:8,  col 48
# layer 4: W4 (2,8)   rows 0:2,  cols 64:72 ; b4 (2,)  rows 0:2,  col 72
SLAB_SHAPE = (16, 128)


def pack_params(params):
    """Pack torch-layout ((out,in) weight, (out,) bias) pairs into one slab."""
    (w1, b1), (w2, b2), (w3, b3), (w4, b4) = params
    slab = jnp.zeros(SLAB_SHAPE, jnp.float32)
    slab = slab.at[0:8, 0:2].set(w1)
    slab = slab.at[0:8, 2:3].set(b1[:, None])
    slab = slab.at[0:16, 8:16].set(w2)
    slab = slab.at[0:16, 16:17].set(b2[:, None])
    slab = slab.at[0:8, 32:48].set(w3)
    slab = slab.at[0:8, 48:49].set(b3[:, None])
    slab = slab.at[0:2, 64:72].set(w4)
    slab = slab.at[0:2, 72:73].set(b4[:, None])
    return slab


def mlp_kernel(p_ref, xt_ref, ot_ref):
    xt = xt_ref[...]                       # (2, TB): batch on the lane axis

    # Layer 1: 2 -> 8.  K=2 contraction -> VPU broadcast-FMA, skip the MXU.
    w1 = p_ref[0:8, 0:2]                   # (8, 2)
    b1 = p_ref[0:8, 2:3]                   # (8, 1)
    h1 = w1[:, 0:1] * xt[0:1, :] + w1[:, 1:2] * xt[1:2, :] + b1
    h1 = jnp.maximum(h1, 0.0)              # (8, TB)

    # Layer 2: 8 -> 16 (MXU, batch is the free lane dimension).
    w2 = p_ref[0:16, 8:16]                 # (16, 8)
    b2 = p_ref[0:16, 16:17]                # (16, 1)
    h2 = jnp.dot(w2, h1, preferred_element_type=jnp.float32) + b2
    h2 = jnp.maximum(h2, 0.0)              # (16, TB)

    # Layer 3: 16 -> 8 (MXU).
    w3 = p_ref[0:8, 32:48]                 # (8, 16)
    b3 = p_ref[0:8, 48:49]                 # (8, 1)
    h3 = jnp.dot(w3, h2, preferred_element_type=jnp.float32) + b3
    h3 = jnp.maximum(h3, 0.0)              # (8, TB)

    # Layer 4: 8 -> 2.  Only 2 output rows -> unrolled VPU FMAs beat the MXU.
    w4 = p_ref[0:2, 64:72]                 # (2, 8)
    b4 = p_ref[0:2, 72:73]                 # (2, 1)
    acc = w4[:, 0:1] * h3[0:1, :] + b4
    for k in range(1, 8):                  # unrolled at trace time (8 iters)
        acc = acc + w4[:, k:k + 1] * h3[k:k + 1, :]

    ot_ref[...] = acc.astype(ot_ref.dtype)  # (2, TB), lane-dense store


def _round_up(n, m):
    return ((n + m - 1) // m) * m


@functools.partial(jax.jit, static_argnames=("tb",))
def mlp_forward(x, packed, *, tb=512):
    """x: (batch, 2) f32 (torch layout). Returns (batch, 2) f32."""
    batch = x.shape[0]
    # Batch tile: multiple of 128 lanes.  512 fits VMEM with large margin on
    # v5e/v6e/v7x; raise toward 2048-8192 for huge batches (stay well under
    # v7x's 64 MiB VMEM when double-buffered).
    tb = min(tb, _round_up(batch, 128))
    padded = _round_up(batch, tb)

    # Put batch on the lane axis and pad it to the tile size.
    xt = jnp.zeros((2, padded), jnp.float32).at[:, :batch].set(x.T)

    out_t = pl.pallas_call(
        mlp_kernel,
        out_shape=jax.ShapeDtypeStruct((2, padded), jnp.float32),
        grid_spec=pltpu.PrefetchScalarGridSpec(
            num_scalar_prefetch=0,
            grid=(padded // tb,),
            in_specs=[
                pl.BlockSpec(SLAB_SHAPE, lambda i: (0, 0)),  # params: resident
                pl.BlockSpec((2, tb), lambda i: (0, i)),     # x^T batch tile
            ],
            out_specs=pl.BlockSpec((2, tb), lambda i: (0, i)),
        ),
        compiler_params=pltpu.CompilerParams(
            dimension_semantics=("parallel",)),
    )(packed, xt)

    return out_t[:, :batch].T


def init_params(key):
    # Torch nn.Linear default init: uniform +/- 1/sqrt(fan_in), weight (out, in).
    dims = [(2, 8), (8, 16), (16, 8), (8, 2)]  # (fan_in, fan_out)
    params = []
    for i, (fan_in, fan_out) in enumerate(dims):
        kw, kb = jax.random.split(jax.random.fold_in(key, i))
        bound = 1.0 / (fan_in ** 0.5)
        w = jax.random.uniform(kw, (fan_out, fan_in), jnp.float32, -bound, bound)
        b = jax.random.uniform(kb, (fan_out,), jnp.float32, -bound, bound)
        params.append((w, b))
    return params


def reference_forward(x, params):
    h = x
    for i, (w, b) in enumerate(params):
        h = h @ w.T + b
        if i < len(params) - 1:
            h = jnp.maximum(h, 0.0)
    return h


if __name__ == "__main__":
    key = jax.random.PRNGKey(0)
    kx, kp = jax.random.split(key)

    batch = 8
    x = jax.random.normal(kx, (batch, 2), jnp.float32)
    params = init_params(kp)
    packed = pack_params(params)

    out = mlp_forward(x, packed)
    out = jax.block_until_ready(out)

    ref = reference_forward(x, params)
    assert out.shape == (batch, 2)
    assert jnp.allclose(out, ref, atol=1e-5, rtol=1e-5)

    print("KERNEL_OK")
</pallas_src>

<mosaic_0001>
module attributes {stable_mosaic.version = 11 : i64} {
  func.func @mlp_kernel(%arg0: i32, %arg1: memref<16x128xf32, #tpu.memory_space<vmem>>, %arg2: memref<2x128xf32, #tpu.memory_space<vmem>>, %arg3: memref<2x128xf32, #tpu.memory_space<vmem>>) attributes {dimension_semantics = [#tpu.dimension_semantics<parallel>], iteration_bounds = array<i64: 1>, scalar_prefetch = 0 : i64, scratch_operands = 0 : i64, tpu.core_type = #tpu.core_type<tc>, window_params = [{pipeline_mode = #tpu.pipeline_mode<synchronous>, transform_indices = @transform_0, window_bounds = array<i64: 16, 128>}, {transform_indices = @transform_1, window_bounds = array<i64: 2, 128>}, {transform_indices = @transform_2, window_bounds = array<i64: 2, 128>}]} {
    %c0 = arith.constant 0 : index
    %c0_0 = arith.constant 0 : index
    %0 = vector.load %arg2[%c0, %c0_0] : memref<2x128xf32, #tpu.memory_space<vmem>>, vector<2x128xf32>
    %c0_1 = arith.constant 0 : index
    %c0_2 = arith.constant 0 : index
    %1 = vector.load %arg1[%c0_1, %c0_2] : memref<16x128xf32, #tpu.memory_space<vmem>>, vector<8x2xf32>
    %c0_3 = arith.constant 0 : index
    %c2 = arith.constant 2 : index
    %2 = vector.load %arg1[%c0_3, %c2] : memref<16x128xf32, #tpu.memory_space<vmem>>, vector<8x1xf32>
    %3 = vector.extract_strided_slice %1 {offsets = [0, 0], sizes = [8, 1], strides = [1, 1]} : vector<8x2xf32> to vector<8x1xf32>
    %4 = vector.extract_strided_slice %0 {offsets = [0, 0], sizes = [1, 128], strides = [1, 1]} : vector<2x128xf32> to vector<1x128xf32>
    %5 = vector.broadcast %3 : vector<8x1xf32> to vector<8x128xf32>
    %6 = vector.broadcast %4 : vector<1x128xf32> to vector<8x128xf32>
    %7 = arith.mulf %5, %6 : vector<8x128xf32>
    %8 = vector.extract_strided_slice %1 {offsets = [0, 1], sizes = [8, 1], strides = [1, 1]} : vector<8x2xf32> to vector<8x1xf32>
    %9 = vector.extract_strided_slice %0 {offsets = [1, 0], sizes = [1, 128], strides = [1, 1]} : vector<2x128xf32> to vector<1x128xf32>
    %10 = vector.broadcast %8 : vector<8x1xf32> to vector<8x128xf32>
    %11 = vector.broadcast %9 : vector<1x128xf32> to vector<8x128xf32>
    %12 = arith.mulf %10, %11 : vector<8x128xf32>
    %13 = arith.addf %7, %12 : vector<8x128xf32>
    %14 = vector.broadcast %2 : vector<8x1xf32> to vector<8x128xf32>
    %15 = arith.addf %13, %14 : vector<8x128xf32>
    %cst = arith.constant 0.000000e+00 : f32
    %16 = vector.broadcast %cst : f32 to vector<8x128xf32>
    %17 = arith.maximumf %15, %16 : vector<8x128xf32>
    %c0_4 = arith.constant 0 : index
    %c8 = arith.constant 8 : index
    %18 = vector.load %arg1[%c0_4, %c8] : memref<16x128xf32, #tpu.memory_space<vmem>>, vector<16x8xf32>
    %c0_5 = arith.constant 0 : index
    %c16 = arith.constant 16 : index
    %19 = vector.load %arg1[%c0_5, %c16] : memref<16x128xf32, #tpu.memory_space<vmem>>, vector<16x1xf32>
    %cst_6 = arith.constant dense<0.000000e+00> : vector<16x128xf32>
    %20 = tpu.matmul %18, %17, %cst_6 {dimension_numbers = #tpu.dot_dimension_numbers<[1], [0], [0], [1], [0, 0, 1, 1], [], []>} : vector<16x8xf32>, vector<8x128xf32>, vector<16x128xf32> -> vector<16x128xf32>
    %21 = vector.broadcast %19 : vector<16x1xf32> to vector<16x128xf32>
    %22 = arith.addf %20, %21 : vector<16x128xf32>
    %cst_7 = arith.constant 0.000000e+00 : f32
    %23 = vector.broadcast %cst_7 : f32 to vector<16x128xf32>
    %24 = arith.maximumf %22, %23 : vector<16x128xf32>
    %c0_8 = arith.constant 0 : index
    %c32 = arith.constant 32 : index
    %25 = vector.load %arg1[%c0_8, %c32] : memref<16x128xf32, #tpu.memory_space<vmem>>, vector<8x16xf32>
    %c0_9 = arith.constant 0 : index
    %c48 = arith.constant 48 : index
    %26 = vector.load %arg1[%c0_9, %c48] : memref<16x128xf32, #tpu.memory_space<vmem>>, vector<8x1xf32>
    %cst_10 = arith.constant dense<0.000000e+00> : vector<8x128xf32>
    %27 = tpu.matmul %25, %24, %cst_10 {dimension_numbers = #tpu.dot_dimension_numbers<[1], [0], [0], [1], [0, 0, 1, 1], [], []>} : vector<8x16xf32>, vector<16x128xf32>, vector<8x128xf32> -> vector<8x128xf32>
    %28 = vector.broadcast %26 : vector<8x1xf32> to vector<8x128xf32>
    %29 = arith.addf %27, %28 : vector<8x128xf32>
    %cst_11 = arith.constant 0.000000e+00 : f32
    %30 = vector.broadcast %cst_11 : f32 to vector<8x128xf32>
    %31 = arith.maximumf %29, %30 : vector<8x128xf32>
    %c0_12 = arith.constant 0 : index
    %c64 = arith.constant 64 : index
    %32 = vector.load %arg1[%c0_12, %c64] : memref<16x128xf32, #tpu.memory_space<vmem>>, vector<2x8xf32>
    %c0_13 = arith.constant 0 : index
    %c72 = arith.constant 72 : index
    %33 = vector.load %arg1[%c0_13, %c72] : memref<16x128xf32, #tpu.memory_space<vmem>>, vector<2x1xf32>
    %34 = vector.extract_strided_slice %32 {offsets = [0, 0], sizes = [2, 1], strides = [1, 1]} : vector<2x8xf32> to vector<2x1xf32>
    %35 = vector.extract_strided_slice %31 {offsets = [0, 0], sizes = [1, 128], strides = [1, 1]} : vector<8x128xf32> to vector<1x128xf32>
    %36 = vector.broadcast %34 : vector<2x1xf32> to vector<2x128xf32>
    %37 = vector.broadcast %35 : vector<1x128xf32> to vector<2x128xf32>
    %38 = arith.mulf %36, %37 : vector<2x128xf32>
    %39 = vector.broadcast %33 : vector<2x1xf32> to vector<2x128xf32>
    %40 = arith.addf %38, %39 : vector<2x128xf32>
    %41 = vector.extract_strided_slice %32 {offsets = [0, 1], sizes = [2, 1], strides = [1, 1]} : vector<2x8xf32> to vector<2x1xf32>
    %42 = vector.extract_strided_slice %31 {offsets = [1, 0], sizes = [1, 128], strides = [1, 1]} : vector<8x128xf32> to vector<1x128xf32>
    %43 = vector.broadcast %41 : vector<2x1xf32> to vector<2x128xf32>
    %44 = vector.broadcast %42 : vector<1x128xf32> to vector<2x128xf32>
    %45 = arith.mulf %43, %44 : vector<2x128xf32>
    %46 = arith.addf %40, %45 : vector<2x128xf32>
    %47 = vector.extract_strided_slice %32 {offsets = [0, 2], sizes = [2, 1], strides = [1, 1]} : vector<2x8xf32> to vector<2x1xf32>
    %48 = vector.extract_strided_slice %31 {offsets = [2, 0], sizes = [1, 128], strides = [1, 1]} : vector<8x128xf32> to vector<1x128xf32>
    %49 = vector.broadcast %47 : vector<2x1xf32> to vector<2x128xf32>
    %50 = vector.broadcast %48 : vector<1x128xf32> to vector<2x128xf32>
    %51 = arith.mulf %49, %50 : vector<2x128xf32>
    %52 = arith.addf %46, %51 : vector<2x128xf32>
    %53 = vector.extract_strided_slice %32 {offsets = [0, 3], sizes = [2, 1], strides = [1, 1]} : vector<2x8xf32> to vector<2x1xf32>
    %54 = vector.extract_strided_slice %31 {offsets = [3, 0], sizes = [1, 128], strides = [1, 1]} : vector<8x128xf32> to vector<1x128xf32>
    %55 = vector.broadcast %53 : vector<2x1xf32> to vector<2x128xf32>
    %56 = vector.broadcast %54 : vector<1x128xf32> to vector<2x128xf32>
    %57 = arith.mulf %55, %56 : vector<2x128xf32>
    %58 = arith.addf %52, %57 : vector<2x128xf32>
    %59 = vector.extract_strided_slice %32 {offsets = [0, 4], sizes = [2, 1], strides = [1, 1]} : vector<2x8xf32> to vector<2x1xf32>
    %60 = vector.extract_strided_slice %31 {offsets = [4, 0], sizes = [1, 128], strides = [1, 1]} : vector<8x128xf32> to vector<1x128xf32>
    %61 = vector.broadcast %59 : vector<2x1xf32> to vector<2x128xf32>
    %62 = vector.broadcast %60 : vector<1x128xf32> to vector<2x128xf32>
    %63 = arith.mulf %61, %62 : vector<2x128xf32>
    %64 = arith.addf %58, %63 : vector<2x128xf32>
    %65 = vector.extract_strided_slice %32 {offsets = [0, 5], sizes = [2, 1], strides = [1, 1]} : vector<2x8xf32> to vector<2x1xf32>
    %66 = vector.extract_strided_slice %31 {offsets = [5, 0], sizes = [1, 128], strides = [1, 1]} : vector<8x128xf32> to vector<1x128xf32>
    %67 = vector.broadcast %65 : vector<2x1xf32> to vector<2x128xf32>
    %68 = vector.broadcast %66 : vector<1x128xf32> to vector<2x128xf32>
    %69 = arith.mulf %67, %68 : vector<2x128xf32>
    %70 = arith.addf %64, %69 : vector<2x128xf32>
    %71 = vector.extract_strided_slice %32 {offsets = [0, 6], sizes = [2, 1], strides = [1, 1]} : vector<2x8xf32> to vector<2x1xf32>
    %72 = vector.extract_strided_slice %31 {offsets = [6, 0], sizes = [1, 128], strides = [1, 1]} : vector<8x128xf32> to vector<1x128xf32>
    %73 = vector.broadcast %71 : vector<2x1xf32> to vector<2x128xf32>
    %74 = vector.broadcast %72 : vector<1x128xf32> to vector<2x128xf32>
    %75 = arith.mulf %73, %74 : vector<2x128xf32>
    %76 = arith.addf %70, %75 : vector<2x128xf32>
    %77 = vector.extract_strided_slice %32 {offsets = [0, 7], sizes = [2, 1], strides = [1, 1]} : vector<2x8xf32> to vector<2x1xf32>
    %78 = vector.extract_strided_slice %31 {offsets = [7, 0], sizes = [1, 128], strides = [1, 1]} : vector<8x128xf32> to vector<1x128xf32>
    %79 = vector.broadcast %77 : vector<2x1xf32> to vector<2x128xf32>
    %80 = vector.broadcast %78 : vector<1x128xf32> to vector<2x128xf32>
    %81 = arith.mulf %79, %80 : vector<2x128xf32>
    %82 = arith.addf %76, %81 : vector<2x128xf32>
    %c0_14 = arith.constant 0 : index
    %c0_15 = arith.constant 0 : index
    %83 = vector.load %arg3[%c0_14, %c0_15] : memref<2x128xf32, #tpu.memory_space<vmem>>, vector<2x128xf32>
    tpu.vector_store %arg3[%c0_14, %c0_15], %82 {strides = array<i32>} : memref<2x128xf32, #tpu.memory_space<vmem>>, vector<2x128xf32>,
    return
  }
  func.func @transform_0(%arg0: i32) -> (i32, i32) {
    %c0_i32 = arith.constant 0 : i32
    %c0_i32_0 = arith.constant 0 : i32
    %c0_i32_1 = arith.constant 0 : i32
    return %c0_i32, %c0_i32_0 : i32, i32
  }
  func.func @transform_1(%arg0: i32) -> (i32, i32) {
    %c0_i32 = arith.constant 0 : i32
    %c0_i32_0 = arith.constant 0 : i32
    return %c0_i32, %arg0 : i32, i32
  }
  func.func @transform_2(%arg0: i32) -> (i32, i32) {
    %c0_i32 = arith.constant 0 : i32
    %c0_i32_0 = arith.constant 0 : i32
    return %c0_i32, %arg0 : i32, i32
  }
}

</mosaic_0001>

<bundles_post_ra>
// kernel: mlp_forward.1
= control target key start
LH: loop header
LB: loop body
LE: loop exit
PB: predicated region body
PF: predicated region fallthrough
CT: control target
= control target key end

     0   :  { %v366_v0 = vmov 0   ;;  %v367_v2 = vmov 2   ;;  %v368_v3 = vmov 1   ;;  %s369_s11 = smov 120   ;;  %v370_v5 = vmov 16   ;;  %s371_s14 = smov 96   ;;  %s433_s0 = inlined_call_operand.vmem [shape: f32[16,128], index: 0, kind: input, shape index: {}]   ;;  %s434_s1 = inlined_call_operand.vmem [shape: f32[2,128], index: 1, kind: input, shape index: {}]   ;;  %s435_s2 = inlined_call_operand.vmem [shape: f32[2,128], index: 2, kind: output, shape index: {}]  }
   0x1   :  { %351 = vset.pattern.permute.xlu0 %v366_v0  ;;  %v12_v1 = vld [vmem:[%s433_s0] sm:$0xff]  ;;  %353 = vset.pattern.permute.xlu1 %v367_v2  ;;  %v40_v4 = vld [vmem:[%s433_s0 + $0x8] sm:$0xff]  ;;  %v18_v6 = vlaneseq  ;;  %vm55_vm0 = vcmask 64512   ;;  %v372_v23 = vmov 0.0|0.0   ;;  %vm373_vm1 = vmmov 0  }
   0x2   :  { %15 = vperm.xlu0 %351, %v12_v1   ;;  %34 = vperm.xlu1 %353, %v12_v1   ;;  %v11_v10 = vld [vmem:[%s434_s1] sm:$0x3]  ;;  %v374_v24 = vmov 0.0   ;;  %v375_v26 = vmov 64   ;;  %v376_v27 = vmov 48   ;;  %v377_v28 = vmov 72  }
   0x3   :  { %v406_v7 = vshrl.u32 %v18_v6, 7  ;;  %329 = vmatprep.subr.bf16.mxu1 %v372_v23  ;;  %326 = vmatprep.mubr.msk.f32.mxu1 %vm373_vm1, %v374_v24  ;;  %v217_v25 = vld [vmem:[%s433_s0] sm:$0x3]  ;;  %v378_v29 = vmov 65   ;;  %v379_v30 = vmov 66   ;;  %v380_v31 = vmov 68  }
   0x4   :  { %v381_v32 = vmov 67   ;;  %v382_v33 = vmov 71   ;;  %v383_v34 = vmov 69   ;;  %v384_v35 = vmov 70  }
   0x5   :  { %v20_v8 = vsub.s32 0, %v406_v7  ;;  %v29_v9 = vsub.s32 1, %v406_v7  ;;  %vm143_vm2 = vcmask 130048   ;;  %v249_v54 = vsub.s32 2, %v406_v7 }
   0x6   :  { %352 = vset.pattern.permute.xlu0 %v368_v3  ;;  %51 = vrot.lane.b32.xlu1 %v12_v1, %s369_s11  ;;  %v259_v58 = vsub.s32 3, %v406_v7  ;;  %v269_v62 = vsub.s32 4, %v406_v7  ;;  %v279_v63 = vsub.s32 5, %v406_v7 }
   0x7   :  { %24 = vperm.xlu0 %352, %v12_v1   ;;  %355 = vset.pattern.permute.xlu1 %v370_v5  ;;  %v21_v13 = vrot.slane %v11_v10, %v20_v8  ;;  %v30_v14 = vrot.slane %v11_v10, %v29_v9 }
   0xa   :  { %53 = vrot.lane.b32.xlu1 %v40_v4, %s369_s11 }
   0xb   :  { %354 = vset.pattern.permute.xlu0 %v370_v5 }
   0xc   :  { %43 = vperm.xlu0 %354, %v12_v1  }
   0xe   :  { %48 = vperm.xlu1 %355, %v40_v4  }
  0x10   :  { %356 = vset.pattern.permute.xlu0 %v376_v27 }
  0x11   :  { %138 = vperm.xlu0 %356, %v12_v1  }
  0x12   :  { %141 = vrot.lane.b32.xlu1 %v12_v1, %s371_s14 }
  0x13   :  { %357 = vset.pattern.permute.xlu1 %v375_v26 }
  0x15   :  { %359 = vset.pattern.permute.xlu0 %v378_v29 }
  0x16   :  { %220 = vperm.xlu1 %357, %v217_v25   ;;  %234 = vperm.xlu0 %359, %v217_v25  }
  0x1a   :  { %358 = vset.pattern.permute.xlu1 %v377_v28  ;;  %362 = vset.pattern.permute.xlu0 %v380_v31 }
  0x1b   :  { %229 = vperm.xlu1 %358, %v217_v25   ;;  %264 = vperm.xlu0 %362, %v217_v25  }
  0x1f   :  { %360 = vset.pattern.permute.xlu1 %v379_v30  ;;  %365 = vset.pattern.permute.xlu0 %v382_v33 }
  0x20   :  { %244 = vperm.xlu1 %360, %v217_v25   ;;  %294 = vperm.xlu0 %365, %v217_v25  }
  0x24   :  { %361 = vset.pattern.permute.xlu1 %v381_v32 }
  0x25   :  { %254 = vperm.xlu1 %361, %v217_v25  }
  0x29   :  { %363 = vset.pattern.permute.xlu1 %v383_v34 }
  0x2a   :  { %274 = vperm.xlu1 %363, %v217_v25  }
  0x2e   :  { %364 = vset.pattern.permute.xlu1 %v384_v35 }
  0x2f   :  { %284 = vperm.xlu1 %364, %v217_v25  }
  0x81   :  { %v16_v11 = vpop.permute.xlu0 %15  ;;  %v35_v12 = vpop.permute.xlu1 %34 }
  0x82   :  { %v22_v17 = vmul.f32 %v21_v13, %v16_v11  ;;  %v299_v13 = vsub.s32 7, %v406_v7 }
  0x85   :  { %v52_v15 = vpop.permute.xlu1 %51 }
  0x86   :  { %v25_v16 = vpop.permute.xlu0 %24  ;;  %319 = vmatprep.mubr.msk.f32.mxu0 %vm55_vm0, %v52_v15 }
  0x87   :  { %v31_v18 = vmul.f32 %v30_v14, %v25_v16 }
  0x89   :  { %v32_v19 = vadd.f32 %v31_v18, %v22_v17  ;;  %v54_v22 = vpop.permute.xlu1 %53 }
  0x8b   :  { %v37_v20 = vadd.f32 %v35_v12, %v32_v19  ;;  %v44_v37 = vpop.permute.xlu0 %43 }
  0x8d   :  { %v38_v21 = vmax.f32 %v37_v20, 0.0  ;;  %v49_v36 = vpop.permute.xlu1 %48 }
  0x8f   :  { %317 = vmatprep.subr.mxu0 %v38_v21 }
  0x90   :  { %318 = vmatpush3.msra.mxu0 %v38_v21  ;;  %v139_v49 = vpop.permute.xlu0 %138 }
  0x91   :  { %320 = vmatmul.mubr.msk.f32.vlgmr.msra.gmra.mrb[0].mxu0 %vm55_vm0, %v54_v22  ;;  %v142_v45 = vpop.permute.xlu1 %141 }
  0x95   :  { %v221_v46 = vpop.permute.xlu1 %220  ;;  %v235_v59 = vpop.permute.xlu0 %234 }
  0x9a   :  { %v230_v47 = vpop.permute.xlu1 %229  ;;  %v265_v10 = vpop.permute.xlu0 %264 }
  0x9f   :  { %v245_v48 = vpop.permute.xlu1 %244  ;;  %v295_v21 = vpop.permute.xlu0 %294 }
  0xa4   :  { %v255_v55 = vpop.permute.xlu1 %254 }
  0xa9   :  { %v275_v3 = vpop.permute.xlu1 %274 }
  0xae   :  { %v285_v17 = vpop.permute.xlu1 %284 }
 0x164   :  { %v321_v38 = vpop.f32.mrb[0].mxu0 }
 0x165   :  { %v132_v39 = vadd.f32 %v321_v38, %v49_v36  ;;  %v126_v40 = vpop.f32.mrb[1].mxu0 }
 0x166   :  { %v127_v41 = vadd.f32 %v126_v40, %v44_v37 }
 0x167   :  { %v136_v42 = vmax.f32 %v132_v39, 0.0 }
 0x168   :  { %v135_v43 = vmax.f32 %v127_v41, 0.0 }
 0x16a   :  { %v330_v44 = vpack.c.bf16 %v136_v42, %v135_v43 }
 0x16c   :  { %331 = vmatpush3.bf16.msra.mxu1 %v330_v44 }
 0x16f   :  { %327 = vmatmul.mubr.msk.f32.vlgmr.msra.gmra.mrb[0].mxu1 %vm143_vm2, %v142_v45 }
 0x242   :  { %v212_v50 = vpop.f32.mrb[0].mxu1 }
 0x243   :  { %v213_v51 = vadd.f32 %v212_v50, %v139_v49  ;;  %v328_v52 = vpop.f32.mrb[1].mxu1 }
 0x245   :  { %v216_v53 = vmax.f32 %v213_v51, 0.0 }
 0x247   :  { %v226_v56 = vrot.slane %v216_v53, %v20_v8  ;;  %v240_v57 = vrot.slane %v216_v53, %v29_v9  ;;  %v250_v61 = vrot.slane %v216_v53, %v249_v54  ;;  %v260_v2 = vrot.slane %v216_v53, %v259_v58 }
 0x248   :  { %v270_v6 = vrot.slane %v216_v53, %v269_v62  ;;  %v289_v8 = vsub.s32 6, %v406_v7  ;;  %v280_v9 = vrot.slane %v216_v53, %v279_v63  ;;  %v300_v20 = vrot.slane %v216_v53, %v299_v13 }
 0x249   :  { %v227_v60 = vmul.f32 %v226_v56, %v221_v46  ;;  %v241_v1 = vmul.f32 %v240_v57, %v235_v59  ;;  %v251_v5 = vmul.f32 %v250_v61, %v245_v48  ;;  %v261_v12 = vmul.f32 %v260_v2, %v255_v55 }
 0x24a   :  { %v271_v15 = vmul.f32 %v270_v6, %v265_v10  ;;  %v290_v16 = vrot.slane %v216_v53, %v289_v8  ;;  %v281_v18 = vmul.f32 %v280_v9, %v275_v3  ;;  %v301_v25 = vmul.f32 %v300_v20, %v295_v21 }
 0x24b   :  { %v232_v0 = vadd.f32 %v230_v47, %v227_v60 }
 0x24c   :  { %v291_v23 = vmul.f32 %v290_v16, %v285_v17 }
 0x24d   :  { %v242_v4 = vadd.f32 %v241_v1, %v232_v0 }
 0x24f   :  { %v252_v11 = vadd.f32 %v251_v5, %v242_v4 }
 0x251   :  { %v262_v14 = vadd.f32 %v261_v12, %v252_v11 }
 0x253   :  { %v272_v19 = vadd.f32 %v271_v15, %v262_v14 }
 0x255   :  { %v282_v22 = vadd.f32 %v281_v18, %v272_v19 }
 0x257   :  { %v292_v24 = vadd.f32 %v291_v23, %v282_v22 }
 0x259   :  { %v302_v26 = vadd.f32 %v301_v25, %v292_v24 }
 0x25b   :  { %303 = vst [vmem:[%s435_s2] sm:$0x3] %v302_v26 }

</bundles_post_ra>
